<compile_context>
chip_gen: v7x
topology: tpu7x:2x2x1
jax: 0.10.0
libtpu: 0.0.40
codegen_flags: <defaults>
</compile_context>

<pallas_src>
import functools

import jax
import jax.numpy as jnp
from jax import lax
from jax.experimental import pallas as pl
from jax.experimental.pallas import tpu as pltpu


_MAX_TILE_BYTES = 2 * 1024 * 1024   # per input/output tile, at x's dtype
_MAX_TILE_ROWS = 1024               # 256-1024 is the measured sweet spot


def _round_up(n: int, m: int) -> int:
    return ((n + m - 1) // m) * m


def _sublane_pack(itemsize: int) -> int:
    # f32 -> 8, bf16 -> 16, int8/fp8 -> 32 rows per packed sublane group.
    return max(8, 32 // max(itemsize, 1))


def _pick_row_tile(rows: int, d: int, itemsize: int) -> int:
    """Largest pack-aligned row tile within the VMEM budget, >=2 tiles if possible."""
    pack = _sublane_pack(itemsize)
    rows_p = _round_up(rows, pack)
    by_budget = _MAX_TILE_BYTES // max(d * itemsize, 1)
    # Cap at half the rows so the 1-D "parallel" grid has work for both v7x
    # TensorCores (and an even split); no-op for large problems.
    half = max(pack, _round_up((rows + 1) // 2, pack))
    t = min(_MAX_TILE_ROWS, by_budget, rows_p, half)
    t = max(pack, (t // pack) * pack)
    return t


def _ada_ln_kernel(cond_ref, x_ref, scale_ref, shift_ref, o_ref, *, eps: float):
    # cond_ref: (1,) int32 scalar-prefetch ref (consumed by the index_maps).
    # x_ref: (row_tile, D) tile; scale_ref/shift_ref: (1, D) selected embedding
    # rows, resident across the whole grid.
    del cond_ref
    x = x_ref[...].astype(jnp.float32)                # upcast in-vreg only
    mean = jnp.mean(x, axis=-1, keepdims=True)
    xc = x - mean
    var = jnp.mean(xc * xc, axis=-1, keepdims=True)   # biased var (PyTorch LN)
    y = xc * lax.rsqrt(var + eps)
    y = y * scale_ref[...].astype(jnp.float32) + shift_ref[...].astype(jnp.float32)
    o_ref[...] = y.astype(o_ref.dtype)


def ada_layer_norm(x: jax.Array,
                   cond_embedding_id: jax.Array,
                   scale_weight: jax.Array,
                   shift_weight: jax.Array,
                   eps: float = 1e-6,
                   row_tile: int | None = None) -> jax.Array:
    """x: (B, T, D); cond_embedding_id: (1,) int; *_weight: (num_embeddings, D)."""
    B, T, D = x.shape
    E, Dw = scale_weight.shape
    assert Dw == D and shift_weight.shape == (E, D)

    cond = jnp.asarray(cond_embedding_id).reshape(-1).astype(jnp.int32)
    # Vocos calls this with a single conditioning id broadcast to all rows.
    assert cond.shape == (1,), (
        "AdaLayerNorm kernel expects a single cond_embedding_id of shape (1,); "
        "per-batch ids would need a per-batch index_map.")

    rows = B * T
    xf = x.reshape(rows, D)
    # (E, 1, D) so the selected row is a lane-dense (1, D) block whose last two
    # dims equal the full array dims (keeps the (8,128) block rule trivially).
    scale_w = scale_weight.reshape(E, 1, D)
    shift_w = shift_weight.reshape(E, 1, D)

    itemsize = jnp.dtype(x.dtype).itemsize
    pack = _sublane_pack(itemsize)
    if row_tile is None:
        row_tile = _pick_row_tile(rows, D, itemsize)
    else:
        row_tile = max(pack, (row_tile // pack) * pack)

    n_tiles = pl.cdiv(rows, row_tile)

    kernel = functools.partial(_ada_ln_kernel, eps=eps)
    out = pl.pallas_call(
        kernel,
        out_shape=jax.ShapeDtypeStruct((rows, D), x.dtype),
        grid_spec=pltpu.PrefetchScalarGridSpec(
            num_scalar_prefetch=1,          # cond id -> SMEM, feeds index_maps
            grid=(n_tiles,),
            in_specs=[
                pl.BlockSpec((row_tile, D), lambda i, cond: (i, 0)),
                pl.BlockSpec((None, 1, D), lambda i, cond: (cond[0], 0, 0)),
                pl.BlockSpec((None, 1, D), lambda i, cond: (cond[0], 0, 0)),
            ],
            out_specs=pl.BlockSpec((row_tile, D), lambda i, cond: (i, 0)),
        ),
        compiler_params=pltpu.CompilerParams(
            dimension_semantics=("parallel",),   # v7x: shard row tiles over both TCs
            vmem_limit_bytes=32 * 1024 * 1024,   # covers v5e default; safe on v7x 64 MiB
        ),
    )(cond, xf, scale_w, shift_w)

    return out.reshape(B, T, D)


def _reference(x, cond_id, scale_w, shift_w, eps=1e-6):
    scale = jnp.take(scale_w, cond_id, axis=0)[:, None, :].astype(jnp.float32)
    shift = jnp.take(shift_w, cond_id, axis=0)[:, None, :].astype(jnp.float32)
    xf = x.astype(jnp.float32)
    mean = jnp.mean(xf, axis=-1, keepdims=True)
    var = jnp.mean((xf - mean) ** 2, axis=-1, keepdims=True)
    y = (xf - mean) / jnp.sqrt(var + eps)
    return (y * scale + shift).astype(x.dtype)


if __name__ == "__main__":
    key = jax.random.PRNGKey(0)
    kx, ks, kh, kx2, kx3 = jax.random.split(key, 5)
    num_embeddings = 4

    # --- small shapes consistent with the module usage -------------------
    B, T, D = 2, 8, 32
    x = jax.random.normal(kx, (B, T, D), dtype=jnp.float32)
    cond_embedding_id = jnp.array([1], dtype=jnp.int32)       # (1,), as in Vocos
    # Module __init__ is ones/zeros; perturb so the modulation path is exercised.
    scale_weight = 1.0 + 0.1 * jax.random.normal(ks, (num_embeddings, D), jnp.float32)
    shift_weight = 0.1 * jax.random.normal(kh, (num_embeddings, D), jnp.float32)

    out = jax.block_until_ready(
        ada_layer_norm(x, cond_embedding_id, scale_weight, shift_weight))
    ref = _reference(x, cond_embedding_id, scale_weight, shift_weight)
    assert out.shape == (B, T, D)
    assert jnp.allclose(out, ref, atol=1e-5, rtol=1e-5), "mismatch vs reference (small)"

    # --- lane-dense D=128 with a ragged row count -------------------------
    B2, T2, D2 = 3, 167, 128                                   # rows = 501 (ragged)
    x2 = jax.random.normal(kx2, (B2, T2, D2), dtype=jnp.float32)
    scale_w2 = 1.0 + 0.1 * jax.random.normal(ks, (num_embeddings, D2), jnp.float32)
    shift_w2 = 0.1 * jax.random.normal(kh, (num_embeddings, D2), jnp.float32)
    cond2 = jnp.array([2], dtype=jnp.int32)

    out2 = jax.block_until_ready(ada_layer_norm(x2, cond2, scale_w2, shift_w2))
    ref2 = _reference(x2, cond2, scale_w2, shift_w2)
    assert out2.shape == (B2, T2, D2)
    assert jnp.allclose(out2, ref2, atol=1e-5, rtol=1e-5), "mismatch vs reference (ragged)"

    # --- bf16 path (sublane pack = 16, dtype-preserving load/store) -------
    x3 = jax.random.normal(kx3, (2, 37, 128), dtype=jnp.bfloat16)
    cond3 = jnp.array([3], dtype=jnp.int32)
    out3 = jax.block_until_ready(ada_layer_norm(x3, cond3, scale_w2, shift_w2))
    ref3 = _reference(x3, cond3, scale_w2, shift_w2)
    assert out3.dtype == jnp.bfloat16
    assert jnp.allclose(out3.astype(jnp.float32), ref3.astype(jnp.float32),
                        atol=2e-2, rtol=2e-2), "mismatch vs reference (bf16)"

    print("KERNEL_OK")
</pallas_src>

<mosaic_0001>
module attributes {stable_mosaic.version = 11 : i64} {
  func.func @_ada_ln_kernel(%arg0: i32, %arg1: memref<1xi32, #tpu.memory_space<smem>>, %arg2: memref<8x32xf32, #tpu.memory_space<vmem>>, %arg3: memref<1x1x32xf32, #tpu.memory_space<vmem>>, %arg4: memref<1x1x32xf32, #tpu.memory_space<vmem>>, %arg5: memref<8x32xf32, #tpu.memory_space<vmem>>) attributes {dimension_semantics = [#tpu.dimension_semantics<parallel>], iteration_bounds = array<i64: 2>, scalar_prefetch = 1 : i64, scratch_operands = 0 : i64, tpu.core_type = #tpu.core_type<tc>, window_params = [{transform_indices = @transform_0, window_bounds = array<i64: 8, 32>}, {transform_indices = @transform_1, window_bounds = array<i64: 1, 1, 32>}, {transform_indices = @transform_2, window_bounds = array<i64: 1, 1, 32>}, {transform_indices = @transform_3, window_bounds = array<i64: 8, 32>}]} {
    %c0 = arith.constant 0 : index
    %c0_0 = arith.constant 0 : index
    %0 = vector.load %arg2[%c0, %c0_0] : memref<8x32xf32, #tpu.memory_space<vmem>>, vector<8x32xf32>
    %cst = arith.constant dense<0.000000e+00> : vector<8xf32>
    %1 = vector.multi_reduction <add>, %0, %cst [1] : vector<8x32xf32> to vector<8xf32>
    %2 = vector.shape_cast %1 : vector<8xf32> to vector<8x1xf32>
    %cst_1 = arith.constant 3.200000e+01 : f32
    %3 = vector.broadcast %cst_1 : f32 to vector<8x1xf32>
    %4 = arith.divf %2, %3 : vector<8x1xf32>
    %5 = vector.broadcast %4 : vector<8x1xf32> to vector<8x32xf32>
    %6 = arith.subf %0, %5 : vector<8x32xf32>
    %7 = arith.mulf %6, %6 : vector<8x32xf32>
    %cst_2 = arith.constant dense<0.000000e+00> : vector<8xf32>
    %8 = vector.multi_reduction <add>, %7, %cst_2 [1] : vector<8x32xf32> to vector<8xf32>
    %9 = vector.shape_cast %8 : vector<8xf32> to vector<8x1xf32>
    %cst_3 = arith.constant 3.200000e+01 : f32
    %10 = vector.broadcast %cst_3 : f32 to vector<8x1xf32>
    %11 = arith.divf %9, %10 : vector<8x1xf32>
    %cst_4 = arith.constant 9.99999997E-7 : f32
    %12 = vector.broadcast %cst_4 : f32 to vector<8x1xf32>
    %13 = arith.addf %11, %12 : vector<8x1xf32>
    %14 = math.rsqrt %13 : vector<8x1xf32>
    %15 = vector.broadcast %14 : vector<8x1xf32> to vector<8x32xf32>
    %16 = arith.mulf %6, %15 : vector<8x32xf32>
    %c0_5 = arith.constant 0 : index
    %c0_6 = arith.constant 0 : index
    %c0_7 = arith.constant 0 : index
    %17 = vector.load %arg3[%c0_5, %c0_6, %c0_7] : memref<1x1x32xf32, #tpu.memory_space<vmem>>, vector<1x1x32xf32>
    %18 = vector.shape_cast %17 : vector<1x1x32xf32> to vector<1x32xf32>
    %19 = vector.broadcast %18 : vector<1x32xf32> to vector<8x32xf32>
    %20 = arith.mulf %16, %19 : vector<8x32xf32>
    %c0_8 = arith.constant 0 : index
    %c0_9 = arith.constant 0 : index
    %c0_10 = arith.constant 0 : index
    %21 = vector.load %arg4[%c0_8, %c0_9, %c0_10] : memref<1x1x32xf32, #tpu.memory_space<vmem>>, vector<1x1x32xf32>
    %22 = vector.shape_cast %21 : vector<1x1x32xf32> to vector<1x32xf32>
    %23 = vector.broadcast %22 : vector<1x32xf32> to vector<8x32xf32>
    %24 = arith.addf %20, %23 : vector<8x32xf32>
    %c0_11 = arith.constant 0 : index
    %c0_12 = arith.constant 0 : index
    %25 = vector.load %arg5[%c0_11, %c0_12] : memref<8x32xf32, #tpu.memory_space<vmem>>, vector<8x32xf32>
    tpu.vector_store %arg5[%c0_11, %c0_12], %24 {strides = array<i32>} : memref<8x32xf32, #tpu.memory_space<vmem>>, vector<8x32xf32>,
    return
  }
  func.func @transform_0(%arg0: i32, %arg1: memref<1xi32, #tpu.memory_space<smem>>) -> (i32, i32) {
    %c0_i32 = arith.constant 0 : i32
    %c0_i32_0 = arith.constant 0 : i32
    return %arg0, %c0_i32 : i32, i32
  }
  func.func @transform_1(%arg0: i32, %arg1: memref<1xi32, #tpu.memory_space<smem>>) -> (i32, i32, i32) {
    %c0 = arith.constant 0 : index
    %0 = memref.load %arg1[%c0] : memref<1xi32, #tpu.memory_space<smem>>
    %c0_i32 = arith.constant 0 : i32
    %c0_i32_0 = arith.constant 0 : i32
    %c0_i32_1 = arith.constant 0 : i32
    return %0, %c0_i32, %c0_i32_0 : i32, i32, i32
  }
  func.func @transform_2(%arg0: i32, %arg1: memref<1xi32, #tpu.memory_space<smem>>) -> (i32, i32, i32) {
    %c0 = arith.constant 0 : index
    %0 = memref.load %arg1[%c0] : memref<1xi32, #tpu.memory_space<smem>>
    %c0_i32 = arith.constant 0 : i32
    %c0_i32_0 = arith.constant 0 : i32
    %c0_i32_1 = arith.constant 0 : i32
    return %0, %c0_i32, %c0_i32_0 : i32, i32, i32
  }
  func.func @transform_3(%arg0: i32, %arg1: memref<1xi32, #tpu.memory_space<smem>>) -> (i32, i32) {
    %c0_i32 = arith.constant 0 : i32
    %c0_i32_0 = arith.constant 0 : i32
    return %arg0, %c0_i32 : i32, i32
  }
}

</mosaic_0001>

<bundles_post_ra>
// kernel: tpu_custom_call.1
= control target key start
LH: loop header
LB: loop body
LE: loop exit
PB: predicated region body
PF: predicated region fallthrough
CT: control target
= control target key end

     0   :  { %s731_s0 = inlined_call_operand.<no memory space> [shape: s32[1], index: 0, kind: input, shape index: {}]   ;;  %s732_s1 = inlined_call_operand.hbm [shape: f32[16,32], index: 1, kind: input, shape index: {}]   ;;  %s733_s2 = inlined_call_operand.vmem [shape: f32[4,1,32], index: 2, kind: input, shape index: {}]   ;;  %s734_s3 = inlined_call_operand.vmem [shape: f32[4,1,32], index: 3, kind: input, shape index: {}]   ;;  %s735_s4 = inlined_call_operand.hbm [shape: f32[16,32], index: 4, kind: output, shape index: {}]  }
   0x1   :  { %9 = sst [smem:[#allocation3]] %s731_s0 }
   0x2   :  { %10 = vsyncpa [#allocation5], 0 }
   0x3   :  { %12 = vsyncpa [#allocation5 + $0x1], 0 }
   0x4   :  { %13 = vsyncpa [#allocation6], 0 }
   0x5   :  { %15 = vsyncpa [#allocation6 + $0x1], 0  ;;  %s561_s17 = smov 0   ;;  %s563_s18 = smov 0  }
   0x6   :  { %s565_s19 = smov 0   ;;  %s567_s20 = smov 0  }
   0x7 LB: > { %s582_s0 = sadd.s32 4294967295, %s529_s20   ;;  %s371_s21 = sadd.s32 4294967294, %s529_s20   ;;  %s529_s20 = sphi %s567_s20, %s750_s20   ;;  %s525_s19 = sphi %s565_s19, %s749_s19   ;;  %s521_s18 = sphi %s563_s18, %s748_s18   ;;  %s517_s17 = sphi %s561_s17, %s747_s17  }
   0x8   : > { %s586_s22 = sadd.s32 1, %s529_s20   ;;  %s28_s23 = sadd.s32 1, %s525_s19 }
   0x9   : > { %s25_s24 = ssub.s32 %s529_s20, %s586_s22  ;;  %p35_p0 = scmp.ne.s32.totalorder %s525_s19, %s521_s18 }
   0xa   : > { %p26_p1 = scmp.eq.s32.totalorder %s25_s24, 0  ;;  %p36_p2 = scmp.eq.s32.totalorder %s529_s20, 0 }
   0xb   : > { %p41_p3 = scmp.ne.s32.totalorder %s521_s18, %s517_s17  ;;  %p42_p4 = scmp.eq.s32.totalorder %s582_s0, 0 }
   0xc   : > { %s598_s25 = scalar_select %p26_p1, %s525_s19, %s28_s23  }
   0xd   : > { %p600_p5 = por %p36_p2, %p35_p0  ;;  %p604_p6 = por %p42_p4, %p41_p3 }
   0xe   : > { %p121_p7 = scmp.eq.s32.totalorder %s582_s0, 1  ;;  %p127_p8 = scmp.eq.s32.totalorder %s371_s21, 1 }
   0xf   : > { %p397_p10 = scmp.lt.s32.totalorder %s529_s20, 2  ;;  %s163_s30 = sand.u32 1, %s525_s19  }
  0x10   : > { %p611_p11 = por %p121_p7, %p35_p0  ;;  %p615_p12 = por %p127_p8, %p41_p3 }
  0x11   : > { %s375_s5 = sshll.u32 %s529_s20, 7  ;;  %s374_s6 = sshll.u32 %s163_s30, 3 }
  0x12   : > { %s739_s28 = scalar_select %p611_p11, 1, 0 }
  0x13   : > { %s740_s29 = scalar_select %p615_p12, 1, 0 }
  0x14   : > { %s624_s9 = scalar_lea.hbm %s732_s1, %s375_s5  ;;  %s167_s10 = scalar_lea.vmem [#allocation4], %s374_s6 }
  0x15   : > { %s174_s11 = sshll.u32 %s167_s10, 4  ;;  %p628_p13 = pnand %p397_p10, %p600_p5  ;;  %s632_s11 = int_to_ptr.vmem [resolvable:$true] %s174_s11 }
  0x16   : > { %s164_s13 = scalar_lea.sflag [#allocation5], %s163_s30  ;;  %s433_s14 = scalar_lea.hbm %s624_s9, 128 }
  0x17   : > { %p434_p2 = scmp.ne.s32.totalorder %s624_s9, %s433_s14  ;;  %p435_p3 = pneg %p628_p13 }
  0x18   : > { %s438_s21 = scalar_lea.hbm %s732_s1, 256  ;;  %p439_p5 = scmp.lt.u32.totalorder %s624_s9, %s732_s1 }
  0x19   : > { %p436_p4 = pnand %p435_p3, %p434_p2  ;;  %p440_p8 = scmp.lt.u32.totalorder %s438_s21, %s433_s14 }
  0x1a   : > { %p442_p9 = scmp.lt.u32.totalorder %s433_s14, %s624_s9 }
  0x1b   : > { %p437_p7 = pneg %p436_p4  ;;  %p441_p10 = por %p440_p8, %p439_p5 }
  0x1d   : > { %p443_p0 = por %p442_p9, %p441_p10 }
  0x1f   : > { %p444_p1 = pnand %p443_p0, %p437_p7 }
  0x21   : > { %447 = shalt.err (!%p444_p1)
}
  0x22   : > { %s448_s26 = scalar_lea.vmem %s632_s11, 128  ;;  %s531_s30 = smov [#allocation4]  }
  0x23   : > { %p449_p2 = scmp.ne.s32.totalorder %s632_s11, %s448_s26  ;;  %s453_s5 = sshll.u32 %s531_s30, 4  ;;  %s454_s5 = int_to_ptr.vmem [resolvable:$false] %s453_s5 }
  0x24   : > { %s455_s6 = scalar_lea.vmem %s454_s5, 256  ;;  %p456_p11 = scmp.lt.s32.totalorder %s632_s11, %s454_s5 }
  0x25   : > { %p451_p4 = pnand %p449_p2, %p435_p3  ;;  %p457_p5 = scmp.lt.s32.totalorder %s455_s6, %s448_s26 }
  0x27   : > { %p452_p12 = pneg %p451_p4  ;;  %p458_p8 = por %p457_p5, %p456_p11 }
  0x29   : > { %p459_p9 = pnand %p458_p8, %p452_p12 }
  0x2b   : > { %462 = shalt.err (!%p459_p9)
}
  0x2c   : > { %392 = dma.hbm_to_vmem [thread:$0]  (!%p628_p13), %s624_s9, 128, %s632_s11, %s164_s13  }
  0x2d   : > { %p742_p0 = scmp.lt.s32.totalorder %s529_s20, 3  ;;  %p743_p1 = scmp.ge.s32.totalorder %s529_s20, 1 }
  0x2f   : > { %p180_p3 = pnand %p743_p1, %p742_p0 }
  0x30   : > { %s666_s7 = sand.u32 (!%p180_p3), 1, %s521_s18  }
  0x31   : > { %183 = sbr.rel (%p180_p3) target bundleno = 385 (0x181), region = 32  ;;  %s377_s8 = sshll.u32 (!%p180_p3), %s666_s7, 3 }
  0x32   : > { %s186_s10 = scalar_lea.sflag (!%p180_p3), [#allocation5], %s666_s7  ;;  %s189_s14 = scalar_lea.vmem (!%p180_p3), [#allocation4], %s377_s8 }
  0x38   : > { %508 = dma.done.wait (%p604_p6), %s186_s10, 128  }
  0x39   : > { %510 = vsyncadd (%p604_p6), %s186_s10, 4294967168  ;;  %vm231_vm0 = vcmask 261120   ;;  %v230_v0 = vld [vmem:[%s189_s14] sm:$0xff]  ;;  %s220_s9 = sld [smem:[#allocation3]]  ;;  %s382_s21 = sshll.u32 %s582_s0, 7 }
  0x3a   : > { %v232_v1 = vsel %vm231_vm0, %v230_v0, 0.0  ;;  %s219_s23 = scalar_lea.vmem [#allocation7], %s377_s8  ;;  %s686_s5 = scalar_lea.hbm %s735_s4, %s382_s21 }
  0x3b   : > { %233 = vadd.xlane.f32.xlu0 %v232_v1  ;;  %s277_s24 = sshll.u32 %s219_s23, 4  ;;  %s264_s6 = scalar_lea.sflag [#allocation6], %s666_s7  ;;  %s688_s24 = int_to_ptr.vmem [resolvable:$true] %s277_s24 }
  0x3c   : > { %s463_s10 = scalar_lea.vmem %s688_s24, 128  ;;  %p744_p12 = scmp.ne.s32.totalorder %s739_s28, 0 }
  0x3d   : > { %p464_p6 = scmp.ne.s32.totalorder %s688_s24, %s463_s10  ;;  %s532_s0 = smov [#allocation7]  }
  0x3e   : > { %s467_s8 = sshll.u32 %s532_s0, 4  ;;  %s468_s8 = int_to_ptr.vmem [resolvable:$false] %s467_s8 }
  0x3f   : > { %p221_p11 = scmp.lt.s32.totalorder %s220_s9, 3  ;;  %p465_p13 = pnand %p464_p6, %p744_p12 }
  0x40   : > { %s469_s14 = scalar_lea.vmem %s468_s8, 256  ;;  %p470_p10 = scmp.lt.s32.totalorder %s688_s24, %s468_s8 }
  0x41   : > { %s752_s9 = smov (!%p221_p11, %s220_s9), 3  ;;  %p466_p7 = pneg %p465_p13 }
  0x42   : > { %s223_s12 = scalar_lea.vmem %s733_s2, %s752_s9  ;;  %s228_s16 = scalar_lea.vmem %s734_s3, %s752_s9 }
  0x43   : > { %v379_v11 = vld [vmem:[%s223_s12] ss:$0 sm:$0xff]  ;;  %p471_p2 = scmp.lt.s32.totalorder %s469_s14, %s463_s10 }
  0x44   : > { %v380_v13 = vld [vmem:[%s228_s16] ss:$0 sm:$0xff] }
  0x45   : > { %p472_p4 = por %p471_p2, %p470_p10 }
  0x47   : > { %p473_p5 = pnand %p472_p4, %p466_p7 }
  0xc8   : > { %v234_v2 = vpop.xlane.xlu0 %233 }
  0xc9   : > { %v236_v3 = vmul.f32 0.03125, %v234_v2 }
  0xcb   : > { %v237_v4 = vsub.f32 %v230_v0, %v236_v3 }
  0xcd   : > { %v238_v5 = vmul.f32 %v237_v4, %v237_v4 }
  0xcf   : > { %v239_v6 = vsel %vm231_vm0, %v238_v5, 0.0 }
  0xd0   : > { %240 = vadd.xlane.f32.xlu0 %v239_v6 }
 0x15d   : > { %v241_v7 = vpop.xlane.xlu0 %240 }
 0x15e   : > { %v242_v8 = vmul.f32 0.03125, %v241_v7 }
 0x160   : > { %v243_v9 = vadd.f32 1e-06, %v242_v8 }
 0x162   : > { %431 = vrsqrt.f32 %v243_v9 }
 0x16c   : > { %v432_v10 = vpop.eup %431 }
 0x16d   : > { %v245_v12 = vmul.f32 %v432_v10, %v237_v4 }
 0x16f   : > { %v253_v14 = vmul.f32 %v379_v11, %v245_v12 }
 0x171   : > { %v261_v15 = vadd.f32 %v380_v13, %v253_v14 }
 0x173   : > { %262 = vst.msk [vmem:[%s219_s23] sm:$0xff] %vm231_vm0, %v261_v15 }
 0x174   : > { %476 = shalt.err (!%p473_p5)
}
 0x175   : > { %s477_s7 = scalar_lea.hbm %s686_s5, 128  ;;  %s481_s11 = scalar_lea.hbm %s735_s4, 256 }
 0x176   : > { %p478_p8 = scmp.ne.s32.totalorder %s686_s5, %s477_s7  ;;  %p482_p1 = scmp.lt.u32.totalorder %s686_s5, %s735_s4 }
 0x177   : > { %p483_p3 = scmp.lt.u32.totalorder %s481_s11, %s477_s7  ;;  %p485_p6 = scmp.lt.u32.totalorder %s477_s7, %s686_s5 }
 0x178   : > { %p479_p9 = pnand %p478_p8, %p744_p12 }
 0x179   : > { %p484_p11 = por %p483_p3, %p482_p1 }
 0x17a   : > { %p480_p0 = pneg %p479_p9 }
 0x17b   : > { %p486_p13 = por %p485_p6, %p484_p11 }
 0x17d   : > { %p487_p7 = pnand %p486_p13, %p480_p0 }
 0x17f   : > { %490 = shalt.err (!%p487_p7)
}
 0x180   : > { %387 = dma.vmem_to_hbm [thread:$0]  (%p744_p12), %s688_s24, 128, %s686_s5, %s264_s6  }
 0x181 PF: > { %s289_s15 = sand.u32 1, %s517_s17   ;;  %p745_p10 = scmp.ne.s32.totalorder %s740_s29, 0 }
 0x182   : > { %p746_p2 = scmp.ge.s32.totalorder %s529_s20, 2  ;;  %s290_s16 = scalar_lea.sflag [#allocation6], %s289_s15 }
 0x184   : > { %p394_p4 = pnand %p746_p2, %p745_p10 }
 0x186   : > { %512 = dma.done.wait (!%p394_p4), %s290_s16, 128  }
 0x187   : > { %514 = vsyncadd (!%p394_p4), %s290_s16, 4294967168  ;;  %p18_p5 = scmp.ge.s32.totalorder %s586_s22, 4   ;;  %s747_s17 = smov %s521_s18 }
 0x188   : > { %s748_s18 = smov %s525_s19  ;;  %s749_s19 = smov %s598_s25 }
 0x189   : > { %s750_s20 = smov %s586_s22  ;;  %20 = sbr.rel (!%p18_p5) target bundleno = 7 (0x7), region = 83 }
 0x190   :  { %295 = vsyncpa [#allocation5], 1 }
 0x191   :  { %297 = vsyncpa [#allocation5 + $0x1], 1 }
 0x192   :  { %298 = vsyncpa [#allocation6], 1 }
 0x193   :  { %300 = vsyncpa [#allocation6 + $0x1], 1 }

</bundles_post_ra>
